<compile_context>
chip_gen: v6e
topology: v6e:2x2x1
jax: 0.10.0
libtpu: 0.0.40
codegen_flags: <defaults>
</compile_context>

<pallas_src>
import math
from functools import partial

import jax
import jax.numpy as jnp
from jax.experimental import pallas as pl
from jax.experimental.pallas import tpu as pltpu


def _round_up(n, m):
    return ((n + m - 1) // m) * m


def _vmem_bytes_estimate(tl, Cp, Hp, Cop, in_bytes):
    """Rough VMEM footprint of one pipelined grid step."""
    weights = 2 * (Cp * Hp + Hp * Cop) * in_bytes        # double-buffered weight blocks
    biases = 2 * (2 * Hp + 3 * Hp + Cop) * 4
    x_blocks = 2 * tl * Cp * in_bytes                    # double-buffered x tile
    halo_blocks = 2 * 2 * Cp * in_bytes
    out_blocks = 2 * tl * Cop * 4
    temps = 3 * tl * Hp * 4 + tl * Hp * in_bytes + tl * Cop * 4
    return weights + biases + x_blocks + halo_blocks + out_blocks + temps


def _pick_l_tile(L, Cp, Hp, Cop, in_bytes, vmem_budget):
    """Largest 8-aligned L-tile that fits the VMEM budget, keeping >= 2 tiles
    per sequence (when L allows) so the pipeline has work to overlap."""
    max_tl = min(2048, max(8, _round_up(pl.cdiv(L, 2), 8)))
    for cand in (2048, 1024, 512, 256, 128, 64, 32, 16, 8):
        if cand <= max_tl and _vmem_bytes_estimate(
                cand, Cp, Hp, Cop, in_bytes) <= vmem_budget:
            return cand
    return 8


def _mlp_kernel(x_ref, halo_ref, w1_ref, b1_ref, wd_ref, bd_ref, w2_ref,
                b2_ref, o_ref, *, tl, L, approx_gelu):
    # x_ref   : (tl, Cp)   one L-tile of the (padded-channel) input
    # halo_ref: (2,  Cp)   x rows just before / just after this tile
    # w1_ref  : (Cp, Hp)   b1_ref: (1, Hp)
    # wd_ref  : (3,  Hp)   depthwise taps (0: left, 1: center, 2: right)
    # bd_ref  : (1,  Hp)
    # w2_ref  : (Hp, Cop)  b2_ref: (1, Cop)
    # o_ref   : (tl, Cop)
    lt = pl.program_id(1)
    start = lt * tl

    w1 = w1_ref[...]
    b1 = b1_ref[...]

    # ---- fc1: 1x1 conv == matmul over channels (tile + its 2 halo rows) ----
    y1 = jnp.dot(x_ref[...], w1, preferred_element_type=jnp.float32) + b1      # (tl, Hp)
    y_halo = jnp.dot(halo_ref[...], w1, preferred_element_type=jnp.float32) + b1  # (2, Hp)

    # Zero the halo rows at the true sequence edges: DWConv zero-pads in
    # y1-space and fc1(0) == b1 != 0.  Scalar conditions -> cheap selects.
    prev_row = jnp.where(start >= 1, y_halo[0:1, :], 0.0)
    next_row = jnp.where(start + tl <= L - 1, y_halo[1:2, :], 0.0)

    # ---- depthwise k=3 conv, fused accumulation -----------------------------
    wd = wd_ref[...]                                       # (3, Hp)
    dw = bd_ref[...] + y1 * wd[1:2, :]

    y1_prev = jnp.concatenate([prev_row, y1[: tl - 1, :]], axis=0)   # y1[l-1]
    dw = dw + y1_prev * wd[0:1, :]

    y1_next = jnp.concatenate([y1[1:, :], next_row], axis=0)         # y1[l+1]
    if L % tl != 0:
        # L was padded to a tile multiple: global row L-1 sits in the tile
        # interior, so its (padded) right neighbour must be masked to zero.
        g = start + jax.lax.broadcasted_iota(jnp.int32, (tl, 1), 0)
        y1_next = jnp.where(g <= L - 2, y1_next, 0.0)
    dw = dw + y1_next * wd[2:3, :]

    # ---- activation ---------------------------------------------------------
    if approx_gelu:
        act = jax.nn.gelu(dw, approximate=True)            # tanh -> EUP slot
    else:
        # exact GELU (PyTorch nn.GELU default, erf-based)
        act = 0.5 * dw * (1.0 + jax.lax.erf(dw * (1.0 / math.sqrt(2.0))))

    # ---- fc2: 1x1 conv == matmul over channels ------------------------------
    out = jnp.dot(act.astype(w2_ref.dtype), w2_ref[...],
                  preferred_element_type=jnp.float32) + b2_ref[...]
    o_ref[...] = out.astype(o_ref.dtype)


def mlp_forward(x_ncl, w1, b1, wd, bd, w2, b2, *, use_bf16_matmul=True,
                approx_gelu=False):
    """x_ncl: (B, C_in, L).  Returns (B, C_out, L); matches the PyTorch Mlp.

    use_bf16_matmul: cast x / w1 / w2 to bf16 (f32 accumulation) for full MXU
      throughput on v6e/v7x (~1e-3..1e-2 relative error vs f32).
    approx_gelu: tanh GELU on the EUP instead of the exact erf GELU.
    """
    B, C_in, L = x_ncl.shape
    H = w1.shape[1]
    C_out = w2.shape[1]

    mm_dtype = jnp.bfloat16 if use_bf16_matmul else x_ncl.dtype
    in_bytes = jnp.dtype(mm_dtype).itemsize

    # Lane-dense channel padding (exact: zero rows/columns contribute nothing).
    Cp = _round_up(max(C_in, 1), 128)
    Hp = _round_up(max(H, 1), 128)
    Cop = _round_up(max(C_out, 1), 128)

    # Generation-aware VMEM budget (v7x: 64 MiB/TC, v5e/v6e: 128 MiB).
    try:
        vmem_cap = int(pltpu.get_tpu_info().vmem_capacity_bytes)
    except Exception:
        vmem_cap = 128 * 1024 * 1024
    vmem_budget = int(vmem_cap * 0.8)

    tl = _pick_l_tile(L, Cp, Hp, Cop, in_bytes, vmem_budget)
    n_lt = pl.cdiv(L, tl)
    L_p = n_lt * tl

    # NCL -> NLC (channels on lanes); pad channels to 128 and L to a tile
    # multiple.  NOTE: an NCL-native layout would remove these wrapper passes;
    # NLC is kept so every MXU pass and the output store are lane-dense.
    x_nlc = jnp.transpose(x_ncl, (0, 2, 1))                 # (B, L, C_in)
    x_p = jnp.pad(x_nlc, ((0, 0), (0, L_p - L), (0, Cp - C_in))).astype(mm_dtype)

    # Halo rows (x[l0-1], x[l0+tl]) for every L-tile: a tiny (B, n_lt, 2, Cp)
    # gather instead of keeping the whole sequence resident in VMEM.
    starts = jnp.arange(n_lt, dtype=jnp.int32) * tl
    halo_idx = jnp.stack(
        [jnp.clip(starts - 1, 0, L_p - 1), jnp.clip(starts + tl, 0, L_p - 1)],
        axis=1)                                             # (n_lt, 2)
    halo = x_p[:, halo_idx, :]                              # (B, n_lt, 2, Cp)

    w1_p = jnp.pad(w1, ((0, Cp - C_in), (0, Hp - H))).astype(mm_dtype)
    w2_p = jnp.pad(w2, ((0, Hp - H), (0, Cop - C_out))).astype(mm_dtype)
    b1_p = jnp.pad(b1, ((0, 0), (0, Hp - H)))
    wd_p = jnp.pad(wd, ((0, 0), (0, Hp - H)))
    bd_p = jnp.pad(bd, ((0, 0), (0, Hp - H)))
    b2_p = jnp.pad(b2, ((0, 0), (0, Cop - C_out)))

    est = _vmem_bytes_estimate(tl, Cp, Hp, Cop, in_bytes)
    vmem_limit = int(min(int(vmem_cap * 0.9),
                         max(int(est * 1.5), 32 * 1024 * 1024)))

    flops = (2 * B * L_p * Hp * (Cp + Cop)     # fc1 + fc2
             + 2 * B * n_lt * 2 * Cp * Hp      # halo fc1 recompute
             + 12 * B * L_p * Hp)              # depthwise + GELU (approx)
    bytes_accessed = (x_p.size * in_bytes + halo.size * in_bytes
                      + (w1_p.size + w2_p.size) * in_bytes
                      + 4 * (b1_p.size + wd_p.size + bd_p.size + b2_p.size)
                      + 4 * B * L_p * Cop)
    cost = pl.CostEstimate(flops=int(flops),
                           transcendentals=int(B * L_p * Hp),
                           bytes_accessed=int(bytes_accessed))

    kernel = partial(_mlp_kernel, tl=tl, L=L, approx_gelu=approx_gelu)

    out_p = pl.pallas_call(
        kernel,
        out_shape=jax.ShapeDtypeStruct((B, L_p, Cop), x_ncl.dtype),
        grid_spec=pltpu.PrefetchScalarGridSpec(
            num_scalar_prefetch=0,
            grid=(B, n_lt),
            in_specs=[
                # x: one (tl, Cp) L-tile per grid step (pipelined, bounded VMEM)
                pl.BlockSpec((None, tl, Cp), lambda b, lt: (b, lt, 0)),
                # halo boundary rows for this tile
                pl.BlockSpec((None, None, 2, Cp), lambda b, lt: (b, lt, 0, 0)),
                # weights / biases: grid-invariant blocks (re-fetch is elided)
                pl.BlockSpec((Cp, Hp), lambda b, lt: (0, 0)),
                pl.BlockSpec((1, Hp), lambda b, lt: (0, 0)),
                pl.BlockSpec((3, Hp), lambda b, lt: (0, 0)),
                pl.BlockSpec((1, Hp), lambda b, lt: (0, 0)),
                pl.BlockSpec((Hp, Cop), lambda b, lt: (0, 0)),
                pl.BlockSpec((1, Cop), lambda b, lt: (0, 0)),
            ],
            out_specs=pl.BlockSpec((None, tl, Cop), lambda b, lt: (b, lt, 0)),
        ),
        compiler_params=pltpu.CompilerParams(
            dimension_semantics=("parallel", "parallel"),
            vmem_limit_bytes=vmem_limit),
        cost_estimate=cost,
    )(x_p, halo, w1_p, b1_p, wd_p, bd_p, w2_p, b2_p)

    out_nlc = out_p[:, :L, :C_out]
    return jnp.transpose(out_nlc, (0, 2, 1))                # (B, C_out, L)


def init_params(key, in_features, hidden_features, out_features):
    """Deterministic init mirroring Mlp._init_weights for Conv1d layers:
       weight ~ N(0, sqrt(2 / fan_out)), fan_out = k^2 * out_ch // groups,
       bias = 0."""
    k1, k2, k3 = jax.random.split(key, 3)

    # fc1: Conv1d(in, hidden, 1) -> fan_out = hidden
    std1 = math.sqrt(2.0 / hidden_features)
    w1 = std1 * jax.random.normal(k1, (in_features, hidden_features),
                                  dtype=jnp.float32)             # (C_in, H)
    b1 = jnp.zeros((1, hidden_features), dtype=jnp.float32)

    # dwconv: Conv1d(hidden, hidden, 3, groups=hidden) -> fan_out = 9
    std_d = math.sqrt(2.0 / 9.0)
    wd = std_d * jax.random.normal(k2, (3, hidden_features),
                                   dtype=jnp.float32)            # (3, H) taps
    bd = jnp.zeros((1, hidden_features), dtype=jnp.float32)

    # fc2: Conv1d(hidden, out, 1) -> fan_out = out
    std2 = math.sqrt(2.0 / out_features)
    w2 = std2 * jax.random.normal(k3, (hidden_features, out_features),
                                  dtype=jnp.float32)             # (H, C_out)
    b2 = jnp.zeros((1, out_features), dtype=jnp.float32)

    return w1, b1, wd, bd, w2, b2


def _reference(x_ncl, w1, b1, wd, bd, w2, b2):
    # pure-JAX reference (NLC internally)
    x = jnp.transpose(x_ncl, (0, 2, 1))                          # (B, L, C_in)
    y1 = jnp.einsum("blc,ch->blh", x, w1) + b1[None]             # (B, L, H)
    yp = jnp.pad(y1, ((0, 0), (1, 1), (0, 0)))
    L = x.shape[1]
    dw = (yp[:, 0:L] * wd[0][None, None]
          + yp[:, 1:L + 1] * wd[1][None, None]
          + yp[:, 2:L + 2] * wd[2][None, None] + bd[None])
    a = 0.5 * dw * (1.0 + jax.lax.erf(dw / math.sqrt(2.0)))
    out = jnp.einsum("blh,ho->blo", a, w2) + b2[None]
    return jnp.transpose(out, (0, 2, 1))


if __name__ == "__main__":
    B, C_in, L = 2, 4, 16
    hidden = 32
    C_out = C_in  # out_features defaults to in_features

    key = jax.random.PRNGKey(0)
    kx, kp = jax.random.split(key)
    x = jax.random.normal(kx, (B, C_in, L), dtype=jnp.float32)   # NCL like PyTorch

    params = init_params(kp, C_in, hidden, C_out)
    ref = _reference(x, *params)

    # f32 matmul path: bit-faithful to the PyTorch module.
    out_f32 = jax.block_until_ready(
        mlp_forward(x, *params, use_bf16_matmul=False))
    assert out_f32.shape == (B, C_out, L)
    assert jnp.allclose(out_f32, ref, atol=1e-5, rtol=1e-5)

    # default bf16 matmul path (f32 accumulation): looser tolerance.
    out_bf16 = jax.block_until_ready(mlp_forward(x, *params))
    assert out_bf16.shape == (B, C_out, L)
    assert jnp.allclose(out_bf16, ref, atol=5e-2, rtol=5e-2)

    print("KERNEL_OK")
</pallas_src>

<mosaic_0001>
module attributes {stable_mosaic.version = 11 : i64} {
  func.func @_mlp_kernel(%arg0: i32, %arg1: i32, %arg2: memref<1x8x128xf32, #tpu.memory_space<vmem>>, %arg3: memref<1x1x2x128xf32, #tpu.memory_space<vmem>>, %arg4: memref<128x128xf32, #tpu.memory_space<vmem>>, %arg5: memref<1x128xf32, #tpu.memory_space<vmem>>, %arg6: memref<3x128xf32, #tpu.memory_space<vmem>>, %arg7: memref<1x128xf32, #tpu.memory_space<vmem>>, %arg8: memref<128x128xf32, #tpu.memory_space<vmem>>, %arg9: memref<1x128xf32, #tpu.memory_space<vmem>>, %arg10: memref<1x8x128xf32, #tpu.memory_space<vmem>>) attributes {dimension_semantics = [#tpu.dimension_semantics<parallel>, #tpu.dimension_semantics<parallel>], iteration_bounds = array<i64: 2, 2>, scalar_prefetch = 0 : i64, scratch_operands = 0 : i64, tpu.core_type = #tpu.core_type<tc>, window_params = [{transform_indices = @transform_0, window_bounds = array<i64: 1, 8, 128>}, {transform_indices = @transform_1, window_bounds = array<i64: 1, 1, 2, 128>}, {pipeline_mode = #tpu.pipeline_mode<synchronous>, transform_indices = @transform_2, window_bounds = array<i64: 128, 128>}, {pipeline_mode = #tpu.pipeline_mode<synchronous>, transform_indices = @transform_3, window_bounds = array<i64: 1, 128>}, {pipeline_mode = #tpu.pipeline_mode<synchronous>, transform_indices = @transform_4, window_bounds = array<i64: 3, 128>}, {pipeline_mode = #tpu.pipeline_mode<synchronous>, transform_indices = @transform_5, window_bounds = array<i64: 1, 128>}, {pipeline_mode = #tpu.pipeline_mode<synchronous>, transform_indices = @transform_6, window_bounds = array<i64: 128, 128>}, {pipeline_mode = #tpu.pipeline_mode<synchronous>, transform_indices = @transform_7, window_bounds = array<i64: 1, 128>}, {transform_indices = @transform_8, window_bounds = array<i64: 1, 8, 128>}]} {
    %c8_i32 = arith.constant 8 : i32
    %0 = arith.muli %arg1, %c8_i32 : i32
    %c0 = arith.constant 0 : index
    %c0_0 = arith.constant 0 : index
    %1 = vector.load %arg4[%c0, %c0_0] : memref<128x128xf32, #tpu.memory_space<vmem>>, vector<128x128xf32>
    %c0_1 = arith.constant 0 : index
    %c0_2 = arith.constant 0 : index
    %2 = vector.load %arg5[%c0_1, %c0_2] : memref<1x128xf32, #tpu.memory_space<vmem>>, vector<1x128xf32>
    %c0_3 = arith.constant 0 : index
    %c0_4 = arith.constant 0 : index
    %c0_5 = arith.constant 0 : index
    %3 = vector.load %arg2[%c0_3, %c0_4, %c0_5] : memref<1x8x128xf32, #tpu.memory_space<vmem>>, vector<1x8x128xf32>
    %4 = vector.shape_cast %3 : vector<1x8x128xf32> to vector<8x128xf32>
    %cst = arith.constant dense<0.000000e+00> : vector<8x128xf32>
    %5 = tpu.matmul %4, %1, %cst {dimension_numbers = #tpu.dot_dimension_numbers<[1], [0], [0], [1], [0, 0, 1, 1], [], []>} : vector<8x128xf32>, vector<128x128xf32>, vector<8x128xf32> -> vector<8x128xf32>
    %6 = vector.broadcast %2 : vector<1x128xf32> to vector<8x128xf32>
    %7 = arith.addf %5, %6 : vector<8x128xf32>
    %c0_6 = arith.constant 0 : index
    %c0_7 = arith.constant 0 : index
    %c0_8 = arith.constant 0 : index
    %c0_9 = arith.constant 0 : index
    %8 = vector.load %arg3[%c0_6, %c0_7, %c0_8, %c0_9] : memref<1x1x2x128xf32, #tpu.memory_space<vmem>>, vector<1x1x2x128xf32>
    %9 = vector.shape_cast %8 : vector<1x1x2x128xf32> to vector<2x128xf32>
    %cst_10 = arith.constant dense<0.000000e+00> : vector<2x128xf32>
    %10 = tpu.matmul %9, %1, %cst_10 {dimension_numbers = #tpu.dot_dimension_numbers<[1], [0], [0], [1], [0, 0, 1, 1], [], []>} : vector<2x128xf32>, vector<128x128xf32>, vector<2x128xf32> -> vector<2x128xf32>
    %11 = vector.broadcast %2 : vector<1x128xf32> to vector<2x128xf32>
    %12 = arith.addf %10, %11 : vector<2x128xf32>
    %c1_i32 = arith.constant 1 : i32
    %13 = arith.cmpi sge, %0, %c1_i32 : i32
    %14 = vector.extract_strided_slice %12 {offsets = [0, 0], sizes = [1, 128], strides = [1, 1]} : vector<2x128xf32> to vector<1x128xf32>
    %cst_11 = arith.constant 0.000000e+00 : f32
    %15 = vector.broadcast %cst_11 : f32 to vector<1x128xf32>
    %16 = arith.select %13, %14, %15 : vector<1x128xf32>
    %c8_i32_12 = arith.constant 8 : i32
    %17 = arith.addi %0, %c8_i32_12 : i32
    %c15_i32 = arith.constant 15 : i32
    %18 = arith.cmpi sle, %17, %c15_i32 : i32
    %19 = vector.extract_strided_slice %12 {offsets = [1, 0], sizes = [1, 128], strides = [1, 1]} : vector<2x128xf32> to vector<1x128xf32>
    %cst_13 = arith.constant 0.000000e+00 : f32
    %20 = vector.broadcast %cst_13 : f32 to vector<1x128xf32>
    %21 = arith.select %18, %19, %20 : vector<1x128xf32>
    %c0_14 = arith.constant 0 : index
    %c0_15 = arith.constant 0 : index
    %22 = vector.load %arg6[%c0_14, %c0_15] : memref<3x128xf32, #tpu.memory_space<vmem>>, vector<3x128xf32>
    %c0_16 = arith.constant 0 : index
    %c0_17 = arith.constant 0 : index
    %23 = vector.load %arg7[%c0_16, %c0_17] : memref<1x128xf32, #tpu.memory_space<vmem>>, vector<1x128xf32>
    %24 = vector.extract_strided_slice %22 {offsets = [1, 0], sizes = [1, 128], strides = [1, 1]} : vector<3x128xf32> to vector<1x128xf32>
    %25 = vector.broadcast %24 : vector<1x128xf32> to vector<8x128xf32>
    %26 = arith.mulf %7, %25 : vector<8x128xf32>
    %27 = vector.broadcast %23 : vector<1x128xf32> to vector<8x128xf32>
    %28 = arith.addf %27, %26 : vector<8x128xf32>
    %29 = vector.extract_strided_slice %7 {offsets = [0, 0], sizes = [7, 128], strides = [1, 1]} : vector<8x128xf32> to vector<7x128xf32>
    %30 = tpu.concatenate %16, %29 in 0 : vector<1x128xf32>, vector<7x128xf32> -> vector<8x128xf32>
    %31 = vector.extract_strided_slice %22 {offsets = [0, 0], sizes = [1, 128], strides = [1, 1]} : vector<3x128xf32> to vector<1x128xf32>
    %32 = vector.broadcast %31 : vector<1x128xf32> to vector<8x128xf32>
    %33 = arith.mulf %30, %32 : vector<8x128xf32>
    %34 = arith.addf %28, %33 : vector<8x128xf32>
    %35 = vector.extract_strided_slice %7 {offsets = [1, 0], sizes = [7, 128], strides = [1, 1]} : vector<8x128xf32> to vector<7x128xf32>
    %36 = tpu.concatenate %35, %21 in 0 : vector<7x128xf32>, vector<1x128xf32> -> vector<8x128xf32>
    %37 = vector.extract_strided_slice %22 {offsets = [2, 0], sizes = [1, 128], strides = [1, 1]} : vector<3x128xf32> to vector<1x128xf32>
    %38 = vector.broadcast %37 : vector<1x128xf32> to vector<8x128xf32>
    %39 = arith.mulf %36, %38 : vector<8x128xf32>
    %40 = arith.addf %34, %39 : vector<8x128xf32>
    %cst_18 = arith.constant 5.000000e-01 : f32
    %41 = vector.broadcast %cst_18 : f32 to vector<8x128xf32>
    %42 = arith.mulf %41, %40 : vector<8x128xf32>
    %cst_19 = arith.constant 0.707106769 : f32
    %43 = vector.broadcast %cst_19 : f32 to vector<8x128xf32>
    %44 = arith.mulf %40, %43 : vector<8x128xf32>
    %45 = math.erf %44 : vector<8x128xf32>
    %cst_20 = arith.constant 1.000000e+00 : f32
    %46 = vector.broadcast %cst_20 : f32 to vector<8x128xf32>
    %47 = arith.addf %46, %45 : vector<8x128xf32>
    %48 = arith.mulf %42, %47 : vector<8x128xf32>
    %c0_21 = arith.constant 0 : index
    %c0_22 = arith.constant 0 : index
    %49 = vector.load %arg8[%c0_21, %c0_22] : memref<128x128xf32, #tpu.memory_space<vmem>>, vector<128x128xf32>
    %cst_23 = arith.constant dense<0.000000e+00> : vector<8x128xf32>
    %50 = tpu.matmul %48, %49, %cst_23 {dimension_numbers = #tpu.dot_dimension_numbers<[1], [0], [0], [1], [0, 0, 1, 1], [], []>} : vector<8x128xf32>, vector<128x128xf32>, vector<8x128xf32> -> vector<8x128xf32>
    %c0_24 = arith.constant 0 : index
    %c0_25 = arith.constant 0 : index
    %51 = vector.load %arg9[%c0_24, %c0_25] : memref<1x128xf32, #tpu.memory_space<vmem>>, vector<1x128xf32>
    %52 = vector.broadcast %51 : vector<1x128xf32> to vector<8x128xf32>
    %53 = arith.addf %50, %52 : vector<8x128xf32>
    %c0_26 = arith.constant 0 : index
    %c0_27 = arith.constant 0 : index
    %c0_28 = arith.constant 0 : index
    %54 = vector.load %arg10[%c0_26, %c0_27, %c0_28] : memref<1x8x128xf32, #tpu.memory_space<vmem>>, vector<1x8x128xf32>
    %55 = vector.shape_cast %54 : vector<1x8x128xf32> to vector<8x128xf32>
    %56 = vector.shape_cast %53 : vector<8x128xf32> to vector<1x8x128xf32>
    tpu.vector_store %arg10[%c0_26, %c0_27, %c0_28], %56 {strides = array<i32>} : memref<1x8x128xf32, #tpu.memory_space<vmem>>, vector<1x8x128xf32>,
    return
  }
  func.func @transform_0(%arg0: i32, %arg1: i32) -> (i32, i32, i32) {
    %c0_i32 = arith.constant 0 : i32
    %c0_i32_0 = arith.constant 0 : i32
    return %arg0, %arg1, %c0_i32 : i32, i32, i32
  }
  func.func @transform_1(%arg0: i32, %arg1: i32) -> (i32, i32, i32, i32) {
    %c0_i32 = arith.constant 0 : i32
    %c0_i32_0 = arith.constant 0 : i32
    %c0_i32_1 = arith.constant 0 : i32
    return %arg0, %arg1, %c0_i32, %c0_i32_0 : i32, i32, i32, i32
  }
  func.func @transform_2(%arg0: i32, %arg1: i32) -> (i32, i32) {
    %c0_i32 = arith.constant 0 : i32
    %c0_i32_0 = arith.constant 0 : i32
    %c0_i32_1 = arith.constant 0 : i32
    return %c0_i32, %c0_i32_0 : i32, i32
  }
  func.func @transform_3(%arg0: i32, %arg1: i32) -> (i32, i32) {
    %c0_i32 = arith.constant 0 : i32
    %c0_i32_0 = arith.constant 0 : i32
    %c0_i32_1 = arith.constant 0 : i32
    return %c0_i32, %c0_i32_0 : i32, i32
  }
  func.func @transform_4(%arg0: i32, %arg1: i32) -> (i32, i32) {
    %c0_i32 = arith.constant 0 : i32
    %c0_i32_0 = arith.constant 0 : i32
    %c0_i32_1 = arith.constant 0 : i32
    return %c0_i32, %c0_i32_0 : i32, i32
  }
  func.func @transform_5(%arg0: i32, %arg1: i32) -> (i32, i32) {
    %c0_i32 = arith.constant 0 : i32
    %c0_i32_0 = arith.constant 0 : i32
    %c0_i32_1 = arith.constant 0 : i32
    return %c0_i32, %c0_i32_0 : i32, i32
  }
  func.func @transform_6(%arg0: i32, %arg1: i32) -> (i32, i32) {
    %c0_i32 = arith.constant 0 : i32
    %c0_i32_0 = arith.constant 0 : i32
    %c0_i32_1 = arith.constant 0 : i32
    return %c0_i32, %c0_i32_0 : i32, i32
  }
  func.func @transform_7(%arg0: i32, %arg1: i32) -> (i32, i32) {
    %c0_i32 = arith.constant 0 : i32
    %c0_i32_0 = arith.constant 0 : i32
    %c0_i32_1 = arith.constant 0 : i32
    return %c0_i32, %c0_i32_0 : i32, i32
  }
  func.func @transform_8(%arg0: i32, %arg1: i32) -> (i32, i32, i32) {
    %c0_i32 = arith.constant 0 : i32
    %c0_i32_0 = arith.constant 0 : i32
    return %arg0, %arg1, %c0_i32 : i32, i32, i32
  }
}

</mosaic_0001>

<bundles_post_ra>
// kernel: tpu_custom_call.1
= control target key start
LH: loop header
LB: loop body
LE: loop exit
PB: predicated region body
PF: predicated region fallthrough
CT: control target
= control target key end

     0   :  { %s1741_s0 = inlined_call_operand.hbm [shape: f32[2,16,128], index: 0, kind: input, shape index: {}]   ;;  %s1742_s1 = inlined_call_operand.hbm [shape: f32[2,2,2,128], index: 1, kind: input, shape index: {}]   ;;  %s1743_s2 = inlined_call_operand.hbm [shape: f32[128,128], index: 2, kind: input, shape index: {}]   ;;  %s1744_s3 = inlined_call_operand.vmem [shape: f32[1,128], index: 3, kind: input, shape index: {}]   ;;  %s1745_s4 = inlined_call_operand.vmem [shape: f32[3,128], index: 4, kind: input, shape index: {}]   ;;  %s1746_s5 = inlined_call_operand.vmem [shape: f32[1,128], index: 5, kind: input, shape index: {}]   ;;  %s1747_s6 = inlined_call_operand.hbm [shape: f32[128,128], index: 6, kind: input, shape index: {}]   ;;  %s1748_s7 = inlined_call_operand.vmem [shape: f32[1,128], index: 7, kind: input, shape index: {}]   ;;  %s1749_s8 = inlined_call_operand.hbm [shape: f32[2,16,128], index: 8, kind: output, shape index: {}]  }
   0x1   :  { %1757 = sst [smem:[#allocation21_spill]] %s1741_s0 }
   0x2   :  { %1758 = sst [smem:[#allocation22_spill]] %s1743_s2 }
   0x3   :  { %1759 = sst [smem:[#allocation23_spill]] %s1746_s5 }
   0x4   :  { %1760 = sst [smem:[#allocation24_spill]] %s1747_s6 }
   0x5   :  { %1761 = sst [smem:[#allocation25_spill]] %s1748_s7 }
   0x6   :  { %1762 = sst [smem:[#allocation26_spill]] %s1749_s8 }
   0x7   :  { %13 = vsyncpa [#allocation3], 0 }
   0x8   :  { %15 = vsyncpa [#allocation3 + $0x1], 0 }
   0x9   :  { %16 = vsyncpa [#allocation6], 0 }
   0xa   :  { %18 = vsyncpa [#allocation6 + $0x1], 0 }
   0xb   :  { %19 = vsyncpa [#allocation9], 0 }
   0xc   :  { %20 = vsyncpa [#allocation4], 0 }
   0xd   :  { %22 = vsyncpa [#allocation4 + $0x1], 0  ;;  %s1433_s27 = smov 0   ;;  %s1435_s28 = smov 0  }
   0xe   :  { %s1437_s29 = smov 0   ;;  %s1439_s30 = smov 0  }
   0xf   :  { %s1441_s9 = smov 0   ;;  %s1443_s10 = smov 0  }
  0x10   :  { %s1445_s11 = smov 0   ;;  %s1447_s12 = smov 0  }
  0x11 LB: > { %1763 = sst [smem:[#allocation16_spill]] %s1349_s27  ;;  %s1474_s13 = sadd.s32 4294967295, %s1377_s12   ;;  %s1377_s12 = sphi %s1447_s12, %s28_s12   ;;  %s1373_s11 = sphi %s1445_s11, %s1798_s11   ;;  %s1369_s10 = sphi %s1443_s10, %s1797_s10   ;;  %s1365_s9 = sphi %s1441_s9, %s1796_s9   ;;  %s1361_s30 = sphi %s1439_s30, %s1795_s30   ;;  %s1357_s29 = sphi %s1437_s29, %s1794_s29   ;;  %s1353_s28 = sphi %s1435_s28, %s1793_s28   ;;  %s1349_s27 = sphi %s1433_s27, %s1792_s27  }
  0x12   : > { %1764 = sst [smem:[#allocation17_spill]] %s1365_s9  ;;  %s869_s14 = sadd.s32 4294967294, %s1377_s12  }
  0x13   : > { %p62_p0 = scmp.ne.s32.totalorder %s1353_s28, %s1349_s27  ;;  %p1750_p1 = scmp.eq.s32.totalorder %s1474_s13, 0 }
  0x14   : > { %p248_p3 = scmp.eq.s32.totalorder %s869_s14, 3  ;;  %p870_p5 = scmp.ge.s32.totalorder %s1377_s12, 1 }
  0x15   : > { %p1483_p4 = por %p1750_p1, %p62_p0  ;;  %p255_p7 = scmp.lt.s32.totalorder %s1377_s12, 5 }
  0x16   : > { %p1488_p6 = por %p248_p3, %p62_p0  ;;  %s1379_s18 = smov [#allocation7]  }
  0x17   : > { %p1493_p8 = pnand %p870_p5, %p255_p7  ;;  %s267_s19 = sshll.u32 %s1379_s18, 4  ;;  %s268_s19 = int_to_ptr.vmem [resolvable:$true] %s267_s19 }
  0x18   : > { %s1766_s16 = scalar_select %p1488_p6, 1, 0 }
  0x19   : > { %p1065_p9 = pneg %p1493_p8  ;;  %s1380_s21 = smov [#allocation8]  }
  0x1a   : > { %1767 = sst [smem:[#allocation18_spill]] %s1766_s16  ;;  %s289_s22 = sshll.u32 %s1380_s21, 4  ;;  %s290_s22 = int_to_ptr.vmem [resolvable:$true] %s289_s22 }
  0x1b   : > { %p1501_p10 = pnand %p1065_p9, %p1750_p1  ;;  %s1172_s23 = scalar_lea.vmem %s268_s19, 2048 }
  0x1c   : > { %p1173_p12 = scmp.ne.s32.totalorder %s268_s19, %s1172_s23  ;;  %p1180_p3 = scmp.lt.s32.totalorder %s268_s19, %s268_s19 }
  0x1d   : > { %p1163_p11 = pneg %p1501_p10  ;;  %p1181_p5 = scmp.lt.s32.totalorder %s1172_s23, %s1172_s23 }
  0x1f   : > { %p1175_p13 = pnand %p1173_p12, %p1163_p11  ;;  %p1182_p7 = por %p1181_p5, %p1180_p3 }
  0x21   : > { %p1176_p0 = pneg %p1175_p13 }
  0x23   : > { %p1183_p9 = pnand %p1182_p7, %p1176_p0 }
  0x25   : > { %1186 = shalt.err (!%p1183_p9)
}
  0x26   : > { %s1381_s24 = smov 128   ;;  %s1382_s25 = smov 8  }
  0x27   : > { %s1770_s2 = sld [smem:[#allocation22_spill]]  ;;  %s1198_s18 = scalar_lea.vmem %s290_s22, 2048 }
  0x28   : > { %p1199_p1 = scmp.ne.s32.totalorder %s290_s22, %s1198_s18  ;;  %p1206_p2 = scmp.lt.s32.totalorder %s290_s22, %s290_s22 }
  0x29   : > { %p1207_p6 = scmp.lt.s32.totalorder %s1198_s18, %s1198_s18 }
  0x2a   : > { %p1201_p12 = pnand %p1199_p1, %p1163_p11 }
  0x2b   : > { %p1208_p3 = por %p1207_p6, %p1206_p2 }
  0x2c   : > { %p1202_p13 = pneg %p1201_p12 }
  0x2d   : > { %1068 = dma.hbm_to_vmem [thread:$0]  (!%p1501_p10), %s1770_s2, 2048, %s268_s19, [#allocation6], %s1381_s24, %s1381_s24, %s1382_s25  }
  0x2e   : > { %p1209_p0 = pnand %p1208_p3, %p1202_p13 }
  0x30   : > { %1212 = shalt.err (!%p1209_p0)
}
  0x31   : > { %s1771_s6 = sld [smem:[#allocation24_spill]]  ;;  %s37_s19 = sadd.s32 1, %s1369_s10 }
  0x32   : > { %s40_s26 = sadd.s32 1, %s1373_s11  ;;  %p38_p1 = scmp.ge.s32.totalorder %s37_s19, 2 }
  0x33   : > { %s49_s20 = sadd.s32 1, %s1357_s29  ;;  %p56_p2 = scmp.ne.s32.totalorder %s1357_s29, %s1353_s28 }
  0x34   : > { %p57_p6 = scmp.eq.s32.totalorder %s1377_s12, 0  ;;  %s1800_s19 = smov (%p38_p1, %s37_s19), 0 }
  0x35   : > { %1772 = sst [smem:[#allocation19_spill]] %s1800_s19  ;;  %s1802_s26 = smov (!%p38_p1, %s40_s26), %s1373_s11 }
  0x36   : > { %s45_s14 = ssub.s32 %s1369_s10, %s1800_s19  ;;  %p1534_p11 = por %p57_p6, %p56_p2 }
  0x37   : > { %1071 = dma.hbm_to_vmem [thread:$0]  (!%p1501_p10), %s1771_s6, 2048, %s290_s22, [#allocation9], %s1381_s24, %s1381_s24, %s1382_s25  }
  0x38   : > { %p42_p10 = scmp.ge.s32.totalorder %s1802_s26, 2  ;;  %p1774_p5 = scmp.eq.s32.totalorder %s1474_s13, 3 }
  0x39   : > { %p1085_p9 = scmp.lt.s32.totalorder %s1377_s12, 4  ;;  %s1546_s24 = sand.u32 1, %s1357_s29  }
  0x3a   : > { %p1540_p7 = por %p1774_p5, %p56_p2  ;;  %s1804_s26 = smov (%p42_p10, %s1802_s26), 0 }
  0x3b   : > { %s874_s25 = sshll.u32 %s1546_s24, 3  ;;  %s44_s21 = ssub.s32 %s1373_s11, %s1804_s26 }
  0x3c   : > { %s1775_s22 = scalar_select %p1540_p7, 1, 0 }
  0x3d   : > { %s46_s23 = sor.u32 %s45_s14, %s44_s21  ;;  %s875_s2 = sshll.u32 %s1373_s11, 1 }
  0x3e   : > { %1776 = sst [smem:[#allocation20_spill]] %s1775_s22  ;;  %p47_p12 = scmp.eq.s32.totalorder %s46_s23, 0 }
  0x3f   : > { %s315_s6 = sadd.s32 %s1369_s10, %s875_s2  ;;  %s310_s16 = scalar_lea.vmem [#allocation2], %s874_s25 }
  0x40   : > { %s876_s19 = sshll.u32 %s315_s6, 7  ;;  %s319_s27 = sshll.u32 %s310_s16, 4  ;;  %s320_s27 = int_to_ptr.vmem [resolvable:$true] %s319_s27 }
  0x41   : > { %s1556_s8 = scalar_select %p47_p12, %s1357_s29, %s49_s20  }
  0x42   : > { %s1777_s0 = sld [smem:[#allocation21_spill]]  ;;  %p1565_p13 = pnand %p1085_p9, %p1534_p11 }
  0x43   : > { %s879_s14 = sshll.u32 %s315_s6, 5  ;;  %s326_s2 = sand.u32 1, %s1377_s12  }
  0x44   : > { %s877_s21 = sshll.u32 %s1546_s24, 1  ;;  %s307_s25 = scalar_lea.sflag [#allocation3], %s1546_s24 }
  0x45   : > { %p1215_p3 = pneg %p1565_p13  ;;  %s1226_s16 = scalar_lea.vmem %s320_s27, 128 }
  0x46   : > { %p1227_p0 = scmp.ne.s32.totalorder %s320_s27, %s1226_s16  ;;  %s1383_s7 = smov [#allocation2]  }
  0x48   : > { %s317_s9 = scalar_lea.hbm %s1777_s0, %s876_s19  ;;  %p1229_p1 = pnand %p1227_p0, %p1215_p3 }
  0x49   : > { %s1231_s19 = sshll.u32 %s1383_s7, 4  ;;  %s1232_s19 = int_to_ptr.vmem [resolvable:$false] %s1231_s19 }
  0x4a   : > { %p1230_p2 = pneg %p1229_p1  ;;  %s1233_s20 = scalar_lea.vmem %s1232_s19, 256 }
  0x4b   : > { %p1234_p6 = scmp.lt.s32.totalorder %s320_s27, %s1232_s19  ;;  %p1235_p11 = scmp.lt.s32.totalorder %s1233_s20, %s1226_s16 }
  0x4d   : > { %p1236_p10 = por %p1235_p11, %p1234_p6 }
  0x4f   : > { %p1237_p5 = pnand %p1236_p10, %p1230_p2 }
  0x51   : > { %1240 = shalt.err (!%p1237_p5)
}
  0x52   : > { %1075 = dma.hbm_to_vmem [thread:$0]  (!%p1565_p13), %s317_s9, 128, %s320_s27, %s307_s25  }
  0x53   : > { %s337_s22 = scalar_lea.hbm %s1742_s1, %s879_s14  ;;  %s330_s24 = scalar_lea.vmem [#allocation5], %s877_s21 }
  0x54   : > { %s339_s23 = sshll.u32 %s330_s24, 4  ;;  %s327_s0 = scalar_lea.sflag [#allocation6], %s326_s2  ;;  %s340_s23 = int_to_ptr.vmem [resolvable:$true] %s339_s23 }
  0x55   : > { %s1254_s7 = scalar_lea.vmem %s340_s23, 32  ;;  %s1384_s16 = smov [#allocation5]  }
  0x56   : > { %p1255_p9 = scmp.ne.s32.totalorder %s340_s23, %s1254_s7  ;;  %s1259_s19 = sshll.u32 %s1384_s16, 4  ;;  %s1260_s19 = int_to_ptr.vmem [resolvable:$false] %s1259_s19 }
  0x57   : > { %s1261_s20 = scalar_lea.vmem %s1260_s19, 64  ;;  %p1262_p1 = scmp.lt.s32.totalorder %s340_s23, %s1260_s19 }
  0x58   : > { %p1257_p12 = pnand %p1255_p9, %p1215_p3  ;;  %p1263_p2 = scmp.lt.s32.totalorder %s1261_s20, %s1254_s7 }
  0x5a   : > { %p1258_p0 = pneg %p1257_p12  ;;  %p1264_p6 = por %p1263_p2, %p1262_p1 }
  0x5c   : > { %p1265_p11 = pnand %p1264_p6, %p1258_p0 }
  0x5e   : > { %1268 = shalt.err (!%p1265_p11)
}
  0x5f   : > { %1078 = dma.hbm_to_vmem [thread:$0]  (!%p1565_p13), %s337_s22, 32, %s340_s23, %s327_s0  }
  0x60   : > { %348 = sbr.rel (%p1493_p8) target bundleno = 577 (0x241), region = 52  ;;  %s1590_s27 = sand.u32 (!%p1493_p8), 1, %s1353_s28  }
  0x61   : > { %s881_s9 = sshll.u32 (!%p1493_p8), %s1590_s27, 3  ;;  %s351_s14 = scalar_lea.sflag (!%p1493_p8), [#allocation3], %s1590_s27 }
  0x62   : > { %s1596_s2 = scalar_lea.vmem (!%p1493_p8), [#allocation2], %s881_s9 }
  0x65   : > { %1328 = dma.done.wait (%p1483_p4), %s351_s14, 128  }
  0x66   : > { %1330 = vsyncadd (%p1483_p4), %s351_s14, 4294967168  ;;  %s359_s0 = sand.u32 1, %s1474_s13   ;;  %s882_s5 = sshll.u32 %s1590_s27, 1 }
  0x67   : > { %s360_s17 = scalar_lea.sflag [#allocation6], %s359_s0  ;;  %s1604_s21 = scalar_lea.vmem [#allocation5], %s882_s5 }
  0x68   : > { %1332 = dma.done.wait (%p1483_p4), %s360_s17, 32  }
  0x69   : > { %1334 = vsyncadd (%p1483_p4), %s360_s17, 4294967264  ;;  %p1779_p8 = scmp.eq.s32.totalorder %s1474_s13, 0 }
  0x6b   : > { %1336 = dma.done.wait (%p1779_p8), [#allocation6], 2048   ;;  %p1780_p13 = pmov %p1779_p8 }
  0x6c   : > { %p1781_p3 = pmov %p1779_p8 }
  0x6d   : > { %1338 = vsyncadd (%p1780_p13), [#allocation6], 4294965248 }
  0x6e   : > { %1340 = dma.done.wait (%p1781_p3), [#allocation9], 2048   ;;  %p1782_p10 = pmov %p1781_p3 }
  0x6f   : > { %v1385_v0 = vmov 0.0   ;;  %vm1386_vm0 = vmmov 0   ;;  %v425_v1 = vld [vmem:[#allocation7 + $0x78] sm:$0xff]  ;;  %v424_v2 = vld [vmem:[#allocation7 + $0x70] sm:$0xff]  ;;  %v423_v3 = vld [vmem:[#allocation7 + $0x68] sm:$0xff]  ;;  %s886_s13 = sshll.u32 %s1361_s30, 3  ;;  %v588_v35 = vlaneseq }
  0x70   : > { %1342 = vsyncadd (%p1782_p10), [#allocation9], 4294965248  ;;  %946 = vmatprep.subr.mxu0 %v1385_v0  ;;  %981 = vmatprep.subr.mxu1 %v1385_v0  ;;  %v422_v4 = vld [vmem:[#allocation7 + $0x60] sm:$0xff]  ;;  %v421_v5 = vld [vmem:[#allocation7 + $0x58] sm:$0xff]  ;;  %s580_s15 = sadd.s32 8, %s886_s13  ;;  %p575_p4 = scmp.ge.s32.totalorder %s886_s13, 1 }
  0x71   : > { %978 = vmatprep.mubr.msk.f32.mxu0 %vm1386_vm0, %v1385_v0  ;;  %1013 = vmatprep.mubr.msk.f32.mxu1 %vm1386_vm0, %v1385_v0  ;;  %v420_v6 = vld [vmem:[#allocation7 + $0x50] sm:$0xff]  ;;  %v419_v7 = vld [vmem:[#allocation7 + $0x48] sm:$0xff]  ;;  %v418_v8 = vld [vmem:[#allocation7 + $0x40] sm:$0xff]  ;;  %p581_p5 = scmp.le.s32.totalorder %s580_s15, 15  ;;  %v589_v36 = vshrl.u32 %v588_v35, 7  ;;  %s1783_s19 = sld [smem:[#allocation23_spill]] }
  0x72   : > { %947 = vmatpush3.msra.mxu0 %v425_v1  ;;  %982 = vmatpush3.msra.mxu1 %v425_v1  ;;  %v417_v9 = vld [vmem:[#allocation7 + $0x38] sm:$0xff]  ;;  %v416_v10 = vld [vmem:[#allocation7 + $0x30] sm:$0xff]  ;;  %v415_v11 = vld [vmem:[#allocation7 + $0x28] sm:$0xff]  ;;  %s576_s25 = scalar_select %p575_p4, 1, 0  ;;  %vm603_vm3 = vcmask 1040384  }
  0x73   : > { %948 = vmatprep.subr.mxu0 %v1385_v0  ;;  %983 = vmatprep.subr.mxu1 %v1385_v0  ;;  %v414_v12 = vld [vmem:[#allocation7 + $0x20] sm:$0xff]  ;;  %v413_v13 = vld [vmem:[#allocation7 + $0x18] sm:$0xff]  ;;  %v412_v14 = vld [vmem:[#allocation7 + $0x10] sm:$0xff]  ;;  %s582_s6 = scalar_select %p581_p5, 1, 0  ;;  %v590_v37 = vsub.s32 1, %v589_v36 }
  0x74   : > { %949 = vmatpush3.msra.mxu0 %v424_v2  ;;  %984 = vmatpush3.msra.mxu1 %v424_v2  ;;  %v411_v15 = vld [vmem:[#allocation7 + $0x8] sm:$0xff]  ;;  %v410_v16 = vld [vmem:[#allocation7] sm:$0xff]  ;;  %v504_v18 = vld [vmem:[%s1604_s21] sm:$0x3]  ;;  %v577_v39 = vstv %s576_s25  ;;  %v607_v42 = vsub.s32 0, %v589_v36  ;;  %v620_v46 = vsub.s32 2, %v589_v36 }
  0x75   : > { %950 = vmatprep.subr.mxu0 %v1385_v0  ;;  %985 = vmatprep.subr.mxu1 %v1385_v0  ;;  %v427_v17 = vld [vmem:[%s1596_s2] sm:$0xff]  ;;  %v641_v22 = vld [vmem:[#allocation8 + $0x60] sm:$0xff]  ;;  %v583_v41 = vstv %s582_s6  ;;  %vm578_vm1 = vcmp.eq.s32.totalorder %v577_v39, 1  ;;  %vm616_vm4 = vcmask 1046528   ;;  %s1784_s20 = sld [smem:[#allocation17_spill]]  ;;  %s408_s15 = scalar_lea.vmem [#allocation10], %s881_s9 }
  0x76   : > { %951 = vmatpush3.msra.mxu0 %v423_v3  ;;  %986 = vmatpush3.msra.mxu1 %v423_v3  ;;  %v644_v19 = vld [vmem:[#allocation8 + $0x78] sm:$0xff]  ;;  %v643_v20 = vld [vmem:[#allocation8 + $0x70] sm:$0xff]  ;;  %v642_v21 = vld [vmem:[#allocation8 + $0x68] sm:$0xff]  ;;  %vm584_vm2 = vcmp.eq.s32.totalorder %v583_v41, 1  ;;  %s1786_s21 = sld [smem:[#allocation25_spill]]  ;;  %s739_s25 = sshll.u32 %s408_s15, 4  ;;  %s740_s25 = int_to_ptr.vmem [resolvable:$true] %s739_s25 }
  0x77   : > { %952 = vmatprep.subr.mxu0 %v1385_v0  ;;  %987 = vmatprep.subr.mxu1 %v1385_v0  ;;  %v640_v23 = vld [vmem:[#allocation8 + $0x58] sm:$0xff]  ;;  %v639_v24 = vld [vmem:[#allocation8 + $0x50] sm:$0xff]  ;;  %v638_v25 = vld [vmem:[#allocation8 + $0x48] sm:$0xff]  ;;  %s1787_s22 = sld [smem:[#allocation26_spill]]  ;;  %s724_s23 = scalar_lea.sflag [#allocation4], %s1590_s27 }
  0x78   : > { %953 = vmatpush3.msra.mxu0 %v422_v4  ;;  %988 = vmatpush3.msra.mxu1 %v422_v4  ;;  %v637_v26 = vld [vmem:[#allocation8 + $0x40] sm:$0xff]  ;;  %v636_v27 = vld [vmem:[#allocation8 + $0x38] sm:$0xff]  ;;  %v635_v28 = vld [vmem:[#allocation8 + $0x30] sm:$0xff]  ;;  %s1387_s7 = smov [#allocation10]  }
  0x79   : > { %954 = vmatprep.subr.mxu0 %v1385_v0  ;;  %989 = vmatprep.subr.mxu1 %v1385_v0  ;;  %v634_v29 = vld [vmem:[#allocation8 + $0x28] sm:$0xff]  ;;  %v633_v30 = vld [vmem:[#allocation8 + $0x20] sm:$0xff]  ;;  %v632_v31 = vld [vmem:[#allocation8 + $0x18] sm:$0xff]  ;;  %s1273_s16 = sshll.u32 %s1387_s7, 4  ;;  %s1274_s16 = int_to_ptr.vmem [resolvable:$false] %s1273_s16 }
  0x7a   : > { %955 = vmatpush3.msra.mxu0 %v421_v5  ;;  %990 = vmatpush3.msra.mxu1 %v421_v5  ;;  %v631_v32 = vld [vmem:[#allocation8 + $0x10] sm:$0xff]  ;;  %v630_v33 = vld [vmem:[#allocation8 + $0x8] sm:$0xff]  ;;  %v629_v34 = vld [vmem:[#allocation8] sm:$0xff]  ;;  %s1275_s9 = scalar_lea.vmem %s1274_s16, 256  ;;  %p1276_p1 = scmp.lt.s32.totalorder %s740_s25, %s1274_s16 }
  0x7b   : > { %956 = vmatprep.subr.mxu0 %v1385_v0  ;;  %991 = vmatprep.subr.mxu1 %v1385_v0  ;;  %v586_v38 = vld [vmem:[%s1745_s4] sm:$0x7]  ;;  %s891_s2 = sshll.u32 %s1784_s20, 1 }
  0x7c   : > { %957 = vmatpush3.msra.mxu0 %v420_v6  ;;  %992 = vmatpush3.msra.mxu1 %v420_v6  ;;  %v887_v40 = vld [vmem:[%s1744_s3] ss:$0 sm:$0xff]  ;;  %v591_v43 = vrot.slane %v586_v38, %v590_v37  ;;  %v608_v50 = vrot.slane %v586_v38, %v607_v42  ;;  %v621_v58 = vrot.slane %v586_v38, %v620_v46  ;;  %s735_s0 = sadd.s32 %s1361_s30, %s891_s2  ;;  %s1269_s30 = scalar_lea.vmem %s740_s25, 128 }
  0x7d   : > { %958 = vmatprep.subr.mxu0 %v1385_v0  ;;  %993 = vmatprep.subr.mxu1 %v1385_v0  ;;  %v888_v49 = vld [vmem:[%s1783_s19] ss:$0 sm:$0xff]  ;;  %s892_s13 = sshll.u32 %s735_s0, 7  ;;  %p1270_p9 = scmp.ne.s32.totalorder %s740_s25, %s1269_s30 }
  0x7e   : > { %959 = vmatpush3.msra.mxu0 %v419_v7  ;;  %994 = vmatpush3.msra.mxu1 %v419_v7  ;;  %s1694_s24 = scalar_lea.hbm %s1787_s22, %s892_s13  ;;  %p1277_p2 = scmp.lt.s32.totalorder %s1275_s9, %s1269_s30 }
  0x7f   : > { %960 = vmatprep.subr.mxu0 %v1385_v0  ;;  %995 = vmatprep.subr.mxu1 %v1385_v0  ;;  %p1271_p12 = pnand %p1270_p9, %p1540_p7 }
  0x80   : > { %961 = vmatpush3.msra.mxu0 %v418_v8  ;;  %996 = vmatpush3.msra.mxu1 %v418_v8  ;;  %v889_v8 = vld [vmem:[%s1786_s21] ss:$0 sm:$0xff]  ;;  %p1278_p6 = por %p1277_p2, %p1276_p1 }
  0x81   : > { %962 = vmatprep.subr.mxu0 %v1385_v0  ;;  %997 = vmatprep.subr.mxu1 %v1385_v0  ;;  %p1272_p0 = pneg %p1271_p12 }
  0x82   : > { %963 = vmatpush3.msra.mxu0 %v417_v9  ;;  %998 = vmatpush3.msra.mxu1 %v417_v9 }
  0x83   : > { %964 = vmatprep.subr.mxu0 %v1385_v0  ;;  %999 = vmatprep.subr.mxu1 %v1385_v0  ;;  %p1279_p11 = pnand %p1278_p6, %p1272_p0 }
  0x84   : > { %965 = vmatpush3.msra.mxu0 %v416_v10  ;;  %1000 = vmatpush3.msra.mxu1 %v416_v10 }
  0x85   : > { %966 = vmatprep.subr.mxu0 %v1385_v0  ;;  %1001 = vmatprep.subr.mxu1 %v1385_v0 }
  0x86   : > { %967 = vmatpush3.msra.mxu0 %v415_v11  ;;  %1002 = vmatpush3.msra.mxu1 %v415_v11 }
  0x87   : > { %968 = vmatprep.subr.mxu0 %v1385_v0  ;;  %1003 = vmatprep.subr.mxu1 %v1385_v0 }
  0x88   : > { %969 = vmatpush3.msra.mxu0 %v414_v12  ;;  %1004 = vmatpush3.msra.mxu1 %v414_v12 }
  0x89   : > { %970 = vmatprep.subr.mxu0 %v1385_v0  ;;  %1005 = vmatprep.subr.mxu1 %v1385_v0 }
  0x8a   : > { %971 = vmatpush3.msra.mxu0 %v413_v13  ;;  %1006 = vmatpush3.msra.mxu1 %v413_v13 }
  0x8b   : > { %972 = vmatprep.subr.mxu0 %v1385_v0  ;;  %1007 = vmatprep.subr.mxu1 %v1385_v0 }
  0x8c   : > { %973 = vmatpush3.msra.mxu0 %v412_v14  ;;  %1008 = vmatpush3.msra.mxu1 %v412_v14 }
  0x8d   : > { %974 = vmatprep.subr.mxu0 %v1385_v0  ;;  %1009 = vmatprep.subr.mxu1 %v1385_v0 }
  0x8e   : > { %975 = vmatpush3.msra.mxu0 %v411_v15  ;;  %1010 = vmatpush3.msra.mxu1 %v411_v15 }
  0x8f   : > { %976 = vmatprep.subr.mxu0 %v1385_v0  ;;  %1011 = vmatprep.subr.mxu1 %v1385_v0 }
  0x90   : > { %977 = vmatpush3.msra.mxu0 %v410_v16  ;;  %1012 = vmatpush3.msra.mxu1 %v410_v16 }
  0x91   : > { %979 = vmatmul.mubr.f32.vlgmr.msra.gmra.mxu0 %v427_v17  ;;  %1014 = vmatmul.mubr.f32.vlgmr.msra.gmra.mxu1 %v504_v18 }
  0x92   : > { %1016 = vmatprep.subr.mxu0 %v1385_v0  ;;  %1048 = vmatprep.mubr.msk.f32.mxu0 %vm1386_vm0, %v1385_v0 }
  0x93   : > { %1017 = vmatpush3.msra.mxu0 %v644_v19 }
  0x94   : > { %1018 = vmatprep.subr.mxu0 %v1385_v0 }
  0x95   : > { %1019 = vmatpush3.msra.mxu0 %v643_v20 }
  0x96   : > { %1020 = vmatprep.subr.mxu0 %v1385_v0 }
  0x97   : > { %1021 = vmatpush3.msra.mxu0 %v642_v21 }
  0x98   : > { %1022 = vmatprep.subr.mxu0 %v1385_v0 }
  0x99   : > { %1023 = vmatpush3.msra.mxu0 %v641_v22 }
  0x9a   : > { %1024 = vmatprep.subr.mxu0 %v1385_v0 }
  0x9b   : > { %1025 = vmatpush3.msra.mxu0 %v640_v23 }
  0x9c   : > { %1026 = vmatprep.subr.mxu0 %v1385_v0 }
  0x9d   : > { %1027 = vmatpush3.msra.mxu0 %v639_v24 }
  0x9e   : > { %1028 = vmatprep.subr.mxu0 %v1385_v0 }
  0x9f   : > { %1029 = vmatpush3.msra.mxu0 %v638_v25 }
  0xa0   : > { %1030 = vmatprep.subr.mxu0 %v1385_v0 }
  0xa1   : > { %1031 = vmatpush3.msra.mxu0 %v637_v26 }
  0xa2   : > { %1032 = vmatprep.subr.mxu0 %v1385_v0 }
  0xa3   : > { %1033 = vmatpush3.msra.mxu0 %v636_v27 }
  0xa4   : > { %1034 = vmatprep.subr.mxu0 %v1385_v0 }
  0xa5   : > { %1035 = vmatpush3.msra.mxu0 %v635_v28 }
  0xa6   : > { %1036 = vmatprep.subr.mxu0 %v1385_v0 }
  0xa7   : > { %1037 = vmatpush3.msra.mxu0 %v634_v29 }
  0xa8   : > { %1038 = vmatprep.subr.mxu0 %v1385_v0 }
  0xa9   : > { %1039 = vmatpush3.msra.mxu0 %v633_v30 }
  0xaa   : > { %1040 = vmatprep.subr.mxu0 %v1385_v0 }
  0xab   : > { %1041 = vmatpush3.msra.mxu0 %v632_v31 }
  0xac   : > { %1042 = vmatprep.subr.mxu0 %v1385_v0 }
  0xad   : > { %1043 = vmatpush3.msra.mxu0 %v631_v32 }
  0xae   : > { %1044 = vmatprep.subr.mxu0 %v1385_v0 }
  0xaf   : > { %1045 = vmatpush3.msra.mxu0 %v630_v33 }
  0xb0   : > { %1046 = vmatprep.subr.mxu0 %v1385_v0 }
  0xb1   : > { %1047 = vmatpush3.msra.mxu0 %v629_v34 }
 0x151   : > { %v500_v44 = vpop.f32.mrf.mxu0  ;;  %v571_v45 = vpop.f32.mrf.mxu1 }
 0x152   : > { %v501_v47 = vadd.f32 %v887_v40, %v500_v44  ;;  %v572_v48 = vadd.f32 %v887_v40, %v571_v45 }
 0x153   : > { %v980_v51 = vpop.f32.mrf.mxu0  ;;  %v1015_v52 = vpop.f32.mrf.mxu1 }
 0x154   : > { %v592_v53 = vmul.f32 %v591_v43, %v501_v47  ;;  %v601_v54 = vrot.slane %v501_v47, 7  ;;  %v611_v55 = vrot.slane %v501_v47, 1  ;;  %v579_v56 = vsel %vm578_vm1, %v572_v48, 0.0 }
 0x155   : > { %v585_v57 = vsel %vm584_vm2, %v572_v48, 0.0 }
 0x156   : > { %v599_v59 = vadd.f32 %v888_v49, %v592_v53  ;;  %v604_v60 = vsel %vm603_vm3, %v579_v56, %v601_v54  ;;  %v614_v61 = vrot.slane %v585_v57, 2 }
 0x157   : > { %v609_v62 = vmul.f32 %v608_v50, %v604_v60 }
 0x158   : > { %v617_v63 = vsel %vm616_vm4, %v611_v55, %v614_v61 }
 0x159   : > { %v610_v0 = vadd.f32 %v609_v62, %v599_v59  ;;  %v622_v1 = vmul.f32 %v621_v58, %v617_v63 }
 0x15b   : > { %v623_v2 = vadd.f32 %v622_v1, %v610_v0 }
 0x15d   : > { %v625_v3 = vmul.f32 0.70710677, %v623_v2  ;;  %v624_v5 = vmul.f32 0.5, %v623_v2 }
 0x15f   : > { %1159 = verf.f32 %v625_v3 }
 0x16c   : > { %v1160_v4 = vpop.eup %1159 }
 0x16d   : > { %v627_v6 = vadd.f32 1.0, %v1160_v4 }
 0x16f   : > { %v628_v7 = vmul.f32 %v627_v6, %v624_v5 }
 0x171   : > { %1049 = vmatmul.mubr.f32.vlgmr.msra.gmra.mxu0 %v628_v7 }
 0x231   : > { %v718_v9 = vpop.f32.mrf.mxu0 }
 0x232   : > { %v719_v10 = vadd.f32 %v889_v8, %v718_v9 }
 0x233   : > { %v1050_v11 = vpop.f32.mrf.mxu0 }
 0x234   : > { %722 = vst [vmem:[%s408_s15] sm:$0xff] %v719_v10 }
 0x235   : > { %1282 = shalt.err (!%p1279_p11)
}
 0x236   : > { %s1283_s19 = scalar_lea.hbm %s1694_s24, 128  ;;  %s1287_s2 = scalar_lea.hbm %s1787_s22, 512 }
 0x237   : > { %p1284_p8 = scmp.ne.s32.totalorder %s1694_s24, %s1283_s19  ;;  %p1288_p10 = scmp.lt.s32.totalorder %s1694_s24, %s1787_s22 }
 0x238   : > { %p1289_p4 = scmp.lt.s32.totalorder %s1287_s2, %s1283_s19 }
 0x239   : > { %p1285_p13 = pnand %p1284_p8, %p1540_p7 }
 0x23a   : > { %p1290_p5 = por %p1289_p4, %p1288_p10 }
 0x23b   : > { %p1286_p3 = pneg %p1285_p13 }
 0x23d   : > { %p1291_p9 = pnand %p1290_p5, %p1286_p3 }
 0x23f   : > { %1294 = shalt.err (!%p1291_p9)
}
 0x240   : > { %1063 = dma.vmem_to_hbm [thread:$0]  (%p1540_p7), %s740_s25, 128, %s1694_s24, %s724_s23  }
 0x241 PF: > { %s1788_s17 = sld [smem:[#allocation16_spill]]  ;;  %p1088_p12 = scmp.ge.s32.totalorder %s1377_s12, 2 }
 0x242   : > { %s1789_s21 = sld [smem:[#allocation18_spill]] }
 0x247   : > { %s751_s13 = sand.u32 1, %s1788_s17  }
 0x248   : > { %p1790_p0 = scmp.ne.s32.totalorder %s1789_s21, 0  ;;  %s752_s15 = scalar_lea.sflag [#allocation4], %s751_s13 }
 0x24a   : > { %p1080_p1 = pnand %p1088_p12, %p1790_p0 }
 0x24c   : > { %p1081_p2 = pneg %p1080_p1 }
 0x24e   : > { %1344 = dma.done.wait (%p1081_p2), %s752_s15, 128  }
 0x24f   : > { %1346 = vsyncadd (%p1081_p2), %s752_s15, 4294967168  ;;  %s28_s12 = sadd.s32 1, %s1377_s12   ;;  %s1791_s14 = sld [smem:[#allocation19_spill]] }
 0x250   : > { %p25_p6 = scmp.ge.s32.totalorder %s28_s12, 6   ;;  %s1792_s27 = smov %s1353_s28 }
 0x251   : > { %s1793_s28 = smov %s1357_s29  ;;  %s1794_s29 = smov %s1556_s8 }
 0x252   : > { %s1795_s30 = smov %s1369_s10  ;;  %s1796_s9 = smov %s1373_s11 }
 0x253   : > { %s1798_s11 = smov %s1804_s26  ;;  %27 = sbr.rel (!%p25_p6) target bundleno = 17 (0x11), region = 118 }
 0x255   : > { %s1797_s10 = smov %s1791_s14 }
 0x258   :  { %757 = vsyncpa [#allocation3], 1 }
 0x259   :  { %759 = vsyncpa [#allocation3 + $0x1], 1 }
 0x25a   :  { %760 = vsyncpa [#allocation6], 1 }
 0x25b   :  { %762 = vsyncpa [#allocation6 + $0x1], 1 }
 0x25c   :  { %763 = vsyncpa [#allocation9], 1 }
 0x25d   :  { %764 = vsyncpa [#allocation4], 1 }
 0x25e   :  { %766 = vsyncpa [#allocation4 + $0x1], 1 }

</bundles_post_ra>
